<compile_context>
chip_gen: v7x
topology: tpu7x:2x2x1
jax: 0.10.0
libtpu: 0.0.40
codegen_flags: <defaults>
</compile_context>

<pallas_src>
import functools

import jax
import jax.numpy as jnp
from jax.experimental import pallas as pl
from jax.experimental.pallas import tpu as pltpu

LANE = 128


# ---------------------------------------------------------------------------
# One-time parameter preparation (hoisted out of the hot path).
# ---------------------------------------------------------------------------
def prepare_gru_params(params, matmul_dtype=jnp.bfloat16):
    """Fuse + transpose + pad the per-gate weights ONCE.

    Returns a dict with:
      W_i : (I,  3*Hp)  input->gates weights   (matmul_dtype)
      W_h : (Hp, 3*Hp)  hidden->gates weights  (matmul_dtype)
      b_h : (1,  3*Hp)  hidden-side biases     (float32)
    Hp = H rounded up to a multiple of 128 (lane-dense).  Padded rows/columns are
    zero, so padded hidden lanes remain exactly zero through the recurrence as
    long as h0 is produced by `pad_hidden` (zero-padded).
    """
    H, _ = params["Wiz"].shape
    Hp = ((H + LANE - 1) // LANE) * LANE

    def w_in(name):    # (H, I) -> (I, Hp)
        return jnp.pad(params[name].T, ((0, 0), (0, Hp - H)))

    def w_hid(name):   # (H, H) -> (Hp, Hp)
        return jnp.pad(params[name].T, ((0, Hp - H), (0, Hp - H)))

    def bias(name):    # (H,) -> (Hp,)
        return jnp.pad(params[name], (0, Hp - H))

    W_i = jnp.concatenate([w_in("Wiz"), w_in("Wir"), w_in("Win")], axis=1)
    W_h = jnp.concatenate([w_hid("Whz"), w_hid("Whr"), w_hid("Whn")], axis=1)
    b_h = jnp.concatenate([bias("bhz"), bias("bhr"), bias("bhn")]).reshape(1, 3 * Hp)
    return {
        "W_i": W_i.astype(matmul_dtype),
        "W_h": W_h.astype(matmul_dtype),
        "b_h": b_h.astype(jnp.float32),
        "H": H,
        "Hp": Hp,
    }


def pad_hidden(h, hp):
    """Zero-pad hidden state (B, H) -> (B, Hp). Do once; keep state padded."""
    return jnp.pad(h, ((0, 0), (0, hp - h.shape[-1])))


# ---------------------------------------------------------------------------
# Single-step kernel (matches MyGRUCell.forward exactly).
# ---------------------------------------------------------------------------
def gru_cell_kernel(x_ref, h_ref, wi_ref, wh_ref, b_ref, o_ref):
    hp = h_ref.shape[-1]
    h = h_ref[...]                                   # f32 state
    xw = jnp.dot(x_ref[...].astype(wi_ref.dtype), wi_ref[...],
                 preferred_element_type=jnp.float32)
    hw = jnp.dot(h.astype(wh_ref.dtype), wh_ref[...],
                 preferred_element_type=jnp.float32) + b_ref[...]
    z = jax.nn.sigmoid(xw[:, :hp] + hw[:, :hp])
    r = jax.nn.sigmoid(xw[:, hp:2 * hp] + hw[:, hp:2 * hp])
    g = jnp.tanh(xw[:, 2 * hp:] + r * hw[:, 2 * hp:])
    o_ref[...] = (g + z * (h - g)).astype(o_ref.dtype)   # (1-z)*g + z*h


def gru_cell(x, h_prev_padded, fused):
    """x: (B, I) f32, h_prev_padded: (B, Hp) f32 -> h_new_padded: (B, Hp) f32."""
    B = x.shape[0]
    Hp = fused["Hp"]
    vm = pl.BlockSpec(memory_space=pltpu.VMEM)   # tiny arrays: whole-array resident
    return pl.pallas_call(
        gru_cell_kernel,
        out_shape=jax.ShapeDtypeStruct((B, Hp), jnp.float32),
        in_specs=[vm] * 5,
        out_specs=vm,
    )(x, h_prev_padded, fused["W_i"], fused["W_h"], fused["b_h"])


# ---------------------------------------------------------------------------
# Hoisted input projection: one big matmul XW = xs @ W_i, done once.
# ---------------------------------------------------------------------------
def _input_proj_kernel(x_ref, wi_ref, xw_ref):
    xw_ref[...] = jnp.dot(x_ref[...], wi_ref[...],
                          preferred_element_type=jnp.float32).astype(xw_ref.dtype)


def input_projection(xs, fused, *, tb, xw_dtype):
    """xs: (T, B, I) -> XW: (T, B, 3*Hp). Time-independent, so ONE wide matmul."""
    T, B, I = xs.shape
    Hp = fused["Hp"]
    wi = fused["W_i"]
    # One-time cast of the inputs to the matmul dtype, outside the recurrence.
    x2 = xs.reshape(T * B, I).astype(wi.dtype)
    rows = tb * B
    xw = pl.pallas_call(
        _input_proj_kernel,
        out_shape=jax.ShapeDtypeStruct((T * B, 3 * Hp), xw_dtype),
        grid_spec=pltpu.PrefetchScalarGridSpec(
            num_scalar_prefetch=0,
            grid=(T // tb,),
            in_specs=[pl.BlockSpec((rows, I), lambda t: (t, 0)),
                      pl.BlockSpec((I, 3 * Hp), lambda t: (0, 0))],
            out_specs=pl.BlockSpec((rows, 3 * Hp), lambda t: (t, 0)),
        ),
        compiler_params=pltpu.CompilerParams(
            dimension_semantics=("parallel",)),
    )(x2, wi)
    return xw.reshape(T, B, 3 * Hp)


# ---------------------------------------------------------------------------
# Time-fused sequence kernel:
#   grid = (batch_blocks [parallel], time_blocks [arbitrary])
#   TB timesteps per grid iteration via an unrolled fori_loop,
#   hidden state carried in VMEM scratch (f32 + matmul-dtype shadow),
#   hidden-side weights resident in VMEM across the whole sequence.
# ---------------------------------------------------------------------------
def gru_seq_kernel(xw_ref, h0_ref, wh_ref, b_ref, y_ref, h_scr, hmm_scr):
    @pl.when(pl.program_id(1) == 0)          # first time block of this batch block
    def _():
        h0 = h0_ref[...]                      # f32, zero-padded hidden lanes
        h_scr[...] = h0
        hmm_scr[...] = h0.astype(hmm_scr.dtype)

    wh = wh_ref[...]                          # hoisted out of the timestep loop
    bias = b_ref[...]
    hp = h_scr.shape[-1]
    tb = xw_ref.shape[0]

    def step(i, carry):
        # Only the h @ W_h matmul remains on the serial critical path.
        hw = jnp.dot(hmm_scr[...], wh, preferred_element_type=jnp.float32) + bias
        xw = xw_ref[i].astype(jnp.float32)    # precomputed x @ W_i for timestep i
        h = h_scr[...]
        z = jax.nn.sigmoid(xw[:, :hp] + hw[:, :hp])
        r = jax.nn.sigmoid(xw[:, hp:2 * hp] + hw[:, hp:2 * hp])
        g = jnp.tanh(xw[:, 2 * hp:] + r * hw[:, 2 * hp:])
        h_new = g + z * (h - g)               # == (1-z)*g + z*h
        h_scr[...] = h_new
        hmm_scr[...] = h_new.astype(hmm_scr.dtype)   # matmul-dtype shadow for next step
        y_ref[i] = h_new.astype(y_ref.dtype)
        return carry

    jax.lax.fori_loop(0, tb, step, 0, unroll=True)


def gru_sequence(xs, h0_padded, fused, *, tb=None, batch_block=None,
                 out_dtype=jnp.float32, xw_dtype=None):
    """xs: (T, B, I) f32, h0_padded: (B, Hp) f32 -> hidden states (T, B, Hp)."""
    T, B, I = xs.shape
    Hp = fused["Hp"]
    if tb is None:
        tb = min(T, 8)
    assert T % tb == 0, "time-block size must divide T"
    if batch_block is None:
        batch_block = B
    assert B % batch_block == 0 and (batch_block % 8 == 0 or batch_block == B), \
        "batch block must divide B and respect the (8,128) sublane tiling"
    if xw_dtype is None:
        xw_dtype = fused["W_i"].dtype

    # (1) Hoisted input projection — one large matmul, off the recurrence.
    xw = input_projection(xs, fused, tb=tb, xw_dtype=xw_dtype)   # (T, B, 3Hp)

    nb = B // batch_block
    nt = T // tb
    grid_spec = pltpu.PrefetchScalarGridSpec(
        num_scalar_prefetch=0,
        grid=(nb, nt),                                     # (batch blocks, time blocks)
        in_specs=[
            pl.BlockSpec((tb, batch_block, 3 * Hp), lambda b, t: (t, b, 0)),  # XW tile
            pl.BlockSpec((batch_block, Hp), lambda b, t: (b, 0)),             # h0 tile
            pl.BlockSpec(fused["W_h"].shape, lambda b, t: (0, 0)),            # resident
            pl.BlockSpec((1, 3 * Hp), lambda b, t: (0, 0)),                   # resident
        ],
        out_specs=pl.BlockSpec((tb, batch_block, Hp), lambda b, t: (t, b, 0)),
        scratch_shapes=[
            pltpu.VMEM((batch_block, Hp), jnp.float32),          # f32 hidden state
            pltpu.VMEM((batch_block, Hp), fused["W_h"].dtype),   # matmul-dtype shadow
        ],
    )
    return pl.pallas_call(
        gru_seq_kernel,
        out_shape=jax.ShapeDtypeStruct((T, B, Hp), out_dtype),
        grid_spec=grid_spec,
        compiler_params=pltpu.CompilerParams(
            # batch blocks are independent (v7x megacore), time is sequential
            dimension_semantics=("parallel", "arbitrary"),
            vmem_limit_bytes=48 * 1024 * 1024,
        ),
    )(xw, h0_padded, fused["W_h"], fused["b_h"])


# ---------------------------------------------------------------------------
# Pure-JAX reference matching the PyTorch forward (high-precision matmuls).
# ---------------------------------------------------------------------------
def gru_cell_ref(x, h_prev, params):
    hi = jax.lax.Precision.HIGHEST
    z = jax.nn.sigmoid(jnp.dot(x, params["Wiz"].T, precision=hi)
                       + jnp.dot(h_prev, params["Whz"].T, precision=hi) + params["bhz"])
    r = jax.nn.sigmoid(jnp.dot(x, params["Wir"].T, precision=hi)
                       + jnp.dot(h_prev, params["Whr"].T, precision=hi) + params["bhr"])
    g = jnp.tanh(jnp.dot(x, params["Win"].T, precision=hi)
                 + r * (jnp.dot(h_prev, params["Whn"].T, precision=hi) + params["bhn"]))
    return (1.0 - z) * g + z * h_prev


if __name__ == "__main__":
    input_size, hidden_size, batch, seq_len = 16, 32, 16, 8

    key = jax.random.PRNGKey(0)
    keys = jax.random.split(key, 12)

    def init(k, shape, fan_in):
        bound = 1.0 / jnp.sqrt(fan_in)
        return jax.random.uniform(k, shape, jnp.float32, -bound, bound)

    params = {
        "Wiz": init(keys[0], (hidden_size, input_size), input_size),
        "Wir": init(keys[1], (hidden_size, input_size), input_size),
        "Win": init(keys[2], (hidden_size, input_size), input_size),
        "Whz": init(keys[3], (hidden_size, hidden_size), hidden_size),
        "Whr": init(keys[4], (hidden_size, hidden_size), hidden_size),
        "Whn": init(keys[5], (hidden_size, hidden_size), hidden_size),
        "bhz": init(keys[6], (hidden_size,), hidden_size),
        "bhr": init(keys[7], (hidden_size,), hidden_size),
        "bhn": init(keys[8], (hidden_size,), hidden_size),
    }

    x = jax.random.normal(keys[9], (batch, input_size), jnp.float32)
    h_prev = jax.random.normal(keys[10], (batch, hidden_size), jnp.float32)
    xs = jax.random.normal(keys[11], (seq_len, batch, input_size), jnp.float32)

    # One-time weight prep (fused / transposed / padded) -- NOT per call.
    fused_f32 = prepare_gru_params(params, matmul_dtype=jnp.float32)
    fused_bf16 = prepare_gru_params(params)            # bf16 MXU fast path (default)
    hp = fused_f32["Hp"]
    h_prev_p = pad_hidden(h_prev, hp)                  # padded lanes MUST be zero

    h_ref = gru_cell_ref(x, h_prev, params)

    # --- Single step, f32 matmuls: semantic-equivalence check. ---
    h_new = jax.block_until_ready(gru_cell(x, h_prev_p, fused_f32))
    assert h_new.shape == (batch, hp)
    assert jnp.allclose(h_new[:, :hidden_size], h_ref, atol=1e-3, rtol=1e-3), \
        "f32 single-step mismatch vs reference"

    # --- Single step, bf16 matmuls (recommended MXU path): looser tolerance. ---
    h_new16 = jax.block_until_ready(gru_cell(x, h_prev_p, fused_bf16))
    assert jnp.allclose(h_new16[:, :hidden_size], h_ref, atol=5e-2, rtol=5e-2), \
        "bf16 single-step mismatch vs reference"

    # --- Step-by-step reference over the sequence. ---
    h = h_prev
    ys_ref = []
    for t in range(seq_len):
        h = gru_cell_ref(xs[t], h, params)
        ys_ref.append(h)
    ys_ref = jnp.stack(ys_ref)

    # --- Sequence kernel, f32: multiple time blocks AND multiple batch blocks
    #     to exercise the scratch carry / per-batch-block reinit paths. ---
    ys = jax.block_until_ready(
        gru_sequence(xs, h_prev_p, fused_f32, tb=4, batch_block=8))
    assert ys.shape == (seq_len, batch, hp)
    assert jnp.allclose(ys[:, :, :hidden_size], ys_ref, atol=1e-3, rtol=1e-3), \
        "f32 sequence kernel mismatch vs reference"
    # Padded hidden lanes must stay exactly zero through the recurrence.
    assert float(jnp.max(jnp.abs(ys[:, :, hidden_size:]))) == 0.0, \
        "padded hidden lanes drifted away from zero"

    # --- Sequence kernel, bf16 fast path (one time block, full batch). ---
    ys16 = jax.block_until_ready(
        gru_sequence(xs, h_prev_p, fused_bf16, tb=8, batch_block=batch))
    assert ys16.shape == (seq_len, batch, hp)
    assert jnp.allclose(ys16[:, :, :hidden_size], ys_ref, atol=1e-1, rtol=1e-1), \
        "bf16 sequence kernel mismatch vs reference"

    print("KERNEL_OK")
</pallas_src>

<mosaic_0001>
module attributes {stable_mosaic.version = 11 : i64} {
  func.func @gru_cell_kernel(%arg0: memref<16x16xf32, #tpu.memory_space<vmem>>, %arg1: memref<16x128xf32, #tpu.memory_space<vmem>>, %arg2: memref<16x384xf32, #tpu.memory_space<vmem>>, %arg3: memref<128x384xf32, #tpu.memory_space<vmem>>, %arg4: memref<1x384xf32, #tpu.memory_space<vmem>>, %arg5: memref<16x128xf32, #tpu.memory_space<vmem>>) attributes {dimension_semantics = [], scalar_prefetch = 0 : i64, scratch_operands = 0 : i64, tpu.core_type = #tpu.core_type<tc>} {
    %c0 = arith.constant 0 : index
    %c0_0 = arith.constant 0 : index
    %0 = vector.load %arg1[%c0, %c0_0] : memref<16x128xf32, #tpu.memory_space<vmem>>, vector<16x128xf32>
    %c0_1 = arith.constant 0 : index
    %c0_2 = arith.constant 0 : index
    %1 = vector.load %arg0[%c0_1, %c0_2] : memref<16x16xf32, #tpu.memory_space<vmem>>, vector<16x16xf32>
    %c0_3 = arith.constant 0 : index
    %c0_4 = arith.constant 0 : index
    %2 = vector.load %arg2[%c0_3, %c0_4] : memref<16x384xf32, #tpu.memory_space<vmem>>, vector<16x384xf32>
    %cst = arith.constant dense<0.000000e+00> : vector<16x384xf32>
    %3 = tpu.matmul %1, %2, %cst {dimension_numbers = #tpu.dot_dimension_numbers<[1], [0], [0], [1], [0, 0, 1, 1], [], []>} : vector<16x16xf32>, vector<16x384xf32>, vector<16x384xf32> -> vector<16x384xf32>
    %c0_5 = arith.constant 0 : index
    %c0_6 = arith.constant 0 : index
    %4 = vector.load %arg3[%c0_5, %c0_6] : memref<128x384xf32, #tpu.memory_space<vmem>>, vector<128x384xf32>
    %cst_7 = arith.constant dense<0.000000e+00> : vector<16x384xf32>
    %5 = tpu.matmul %0, %4, %cst_7 {dimension_numbers = #tpu.dot_dimension_numbers<[1], [0], [0], [1], [0, 0, 1, 1], [], []>} : vector<16x128xf32>, vector<128x384xf32>, vector<16x384xf32> -> vector<16x384xf32>
    %c0_8 = arith.constant 0 : index
    %c0_9 = arith.constant 0 : index
    %6 = vector.load %arg4[%c0_8, %c0_9] : memref<1x384xf32, #tpu.memory_space<vmem>>, vector<1x384xf32>
    %7 = vector.broadcast %6 : vector<1x384xf32> to vector<16x384xf32>
    %8 = arith.addf %5, %7 : vector<16x384xf32>
    %9 = vector.extract_strided_slice %3 {offsets = [0, 0], sizes = [16, 128], strides = [1, 1]} : vector<16x384xf32> to vector<16x128xf32>
    %10 = vector.extract_strided_slice %8 {offsets = [0, 0], sizes = [16, 128], strides = [1, 1]} : vector<16x384xf32> to vector<16x128xf32>
    %11 = arith.addf %9, %10 : vector<16x128xf32>
    %12 = arith.negf %11 : vector<16x128xf32>
    %13 = math.exp %12 : vector<16x128xf32>
    %cst_10 = arith.constant 1.000000e+00 : f32
    %14 = vector.broadcast %cst_10 : f32 to vector<16x128xf32>
    %15 = arith.addf %14, %13 : vector<16x128xf32>
    %16 = arith.divf %14, %15 : vector<16x128xf32>
    %17 = vector.extract_strided_slice %3 {offsets = [0, 128], sizes = [16, 128], strides = [1, 1]} : vector<16x384xf32> to vector<16x128xf32>
    %18 = vector.extract_strided_slice %8 {offsets = [0, 128], sizes = [16, 128], strides = [1, 1]} : vector<16x384xf32> to vector<16x128xf32>
    %19 = arith.addf %17, %18 : vector<16x128xf32>
    %20 = arith.negf %19 : vector<16x128xf32>
    %21 = math.exp %20 : vector<16x128xf32>
    %cst_11 = arith.constant 1.000000e+00 : f32
    %22 = vector.broadcast %cst_11 : f32 to vector<16x128xf32>
    %23 = arith.addf %22, %21 : vector<16x128xf32>
    %24 = arith.divf %22, %23 : vector<16x128xf32>
    %25 = vector.extract_strided_slice %3 {offsets = [0, 256], sizes = [16, 128], strides = [1, 1]} : vector<16x384xf32> to vector<16x128xf32>
    %26 = vector.extract_strided_slice %8 {offsets = [0, 256], sizes = [16, 128], strides = [1, 1]} : vector<16x384xf32> to vector<16x128xf32>
    %27 = arith.mulf %24, %26 : vector<16x128xf32>
    %28 = arith.addf %25, %27 : vector<16x128xf32>
    %29 = math.tanh %28 : vector<16x128xf32>
    %30 = arith.subf %0, %29 : vector<16x128xf32>
    %31 = arith.mulf %16, %30 : vector<16x128xf32>
    %32 = arith.addf %29, %31 : vector<16x128xf32>
    %c0_12 = arith.constant 0 : index
    %c0_13 = arith.constant 0 : index
    %33 = vector.load %arg5[%c0_12, %c0_13] : memref<16x128xf32, #tpu.memory_space<vmem>>, vector<16x128xf32>
    tpu.vector_store %arg5[%c0_12, %c0_13], %32 {strides = array<i32>} : memref<16x128xf32, #tpu.memory_space<vmem>>, vector<16x128xf32>,
    return
  }
}

</mosaic_0001>

<bundles_post_ra>
// kernel: tpu_custom_call.1
= control target key start
LH: loop header
LB: loop body
LE: loop exit
PB: predicated region body
PF: predicated region fallthrough
CT: control target
= control target key end

     0   :  { %10 = vsyncpa [#allocation3], 0  ;;  %s960_s0 = inlined_call_operand.hbm [shape: f32[16,16], index: 0, kind: input, shape index: {}]   ;;  %s961_s1 = inlined_call_operand.hbm [shape: f32[16,128], index: 1, kind: input, shape index: {}]   ;;  %s962_s2 = inlined_call_operand.hbm [shape: f32[16,384], index: 2, kind: input, shape index: {}]   ;;  %s963_s3 = inlined_call_operand.hbm [shape: f32[128,384], index: 3, kind: input, shape index: {}]   ;;  %s964_s4 = inlined_call_operand.vmem [shape: f32[1,384], index: 4, kind: input, shape index: {}]   ;;  %s965_s5 = inlined_call_operand.hbm [shape: f32[16,128], index: 5, kind: output, shape index: {}]  }
   0x1   :  { %11 = vsyncpa [#allocation6], 0 }
   0x2   :  { %12 = vsyncpa [#allocation9], 0 }
   0x3   :  { %13 = vsyncpa [#allocation4], 0  ;;  %s823_s18 = smov [#allocation5]   ;;  %s824_s20 = smov [#allocation2]  }
   0x4   :  { %s31_s19 = sshll.u32 %s823_s18, 4  ;;  %s19_s21 = sshll.u32 %s824_s20, 4  ;;  %s32_s19 = int_to_ptr.vmem [resolvable:$true] %s31_s19  ;;  %s863_s21 = int_to_ptr.vmem [resolvable:$true] %s19_s21 }
   0x5   :  { %s705_s24 = scalar_lea.hbm %s961_s1, 256 }
   0x6   :  { %p706_p0 = scmp.ne.s32.totalorder %s961_s1, %s705_s24  ;;  %p709_p1 = scmp.lt.u32.totalorder %s705_s24, %s961_s1 }
   0x8   :  { %p711_p2 = pnand %p709_p1, %p706_p0 }
   0xa   :  { %714 = shalt.err (!%p711_p2)
}
   0xb   :  { %s715_s29 = scalar_lea.vmem %s32_s19, 256  ;;  %p720_p4 = scmp.lt.s32.totalorder %s32_s19, %s32_s19 }
   0xc   :  { %p716_p3 = scmp.ne.s32.totalorder %s32_s19, %s715_s29  ;;  %p721_p5 = scmp.lt.s32.totalorder %s715_s29, %s715_s29 }
   0xe   :  { %p722_p6 = por %p721_p5, %p720_p4 }
  0x10   :  { %p723_p7 = pnand %p722_p6, %p716_p3 }
  0x12   :  { %726 = shalt.err (!%p723_p7)
}
  0x13   :  { %s825_s30 = smov 128   ;;  %s826_s6 = smov 8  }
  0x14   :  { %37 = dma.hbm_to_vmem [thread:$0]  %s961_s1, 256, %s32_s19, [#allocation6], %s825_s30, %s825_s30, %s826_s6  }
  0x15   :  { %s727_s11 = scalar_lea.hbm %s960_s0, 256 }
  0x16   :  { %p728_p8 = scmp.ne.s32.totalorder %s960_s0, %s727_s11  ;;  %p731_p9 = scmp.lt.u32.totalorder %s727_s11, %s960_s0 }
  0x18   :  { %p733_p10 = pnand %p731_p9, %p728_p8 }
  0x1a   :  { %736 = shalt.err (!%p733_p10)
}
  0x1b   :  { %s737_s16 = scalar_lea.vmem %s863_s21, 256  ;;  %p742_p12 = scmp.lt.s32.totalorder %s863_s21, %s863_s21 }
  0x1c   :  { %p738_p11 = scmp.ne.s32.totalorder %s863_s21, %s737_s16  ;;  %p743_p13 = scmp.lt.s32.totalorder %s737_s16, %s737_s16 }
  0x1e   :  { %p744_p0 = por %p743_p13, %p742_p12 }
  0x20   :  { %p745_p1 = pnand %p744_p0, %p738_p11 }
  0x22   :  { %748 = shalt.err (!%p745_p1)
}
  0x23   :  { %25 = dma.hbm_to_vmem [thread:$0]  %s960_s0, 256, %s863_s21, [#allocation3], %s825_s30, %s825_s30, %s826_s6  }
  0x24   :  { %s827_s18 = smov [#allocation7]   ;;  %s749_s23 = scalar_lea.hbm %s962_s2, 768 }
  0x25   :  { %s43_s19 = sshll.u32 %s827_s18, 4  ;;  %p750_p2 = scmp.ne.s32.totalorder %s962_s2, %s749_s23  ;;  %s44_s19 = int_to_ptr.vmem [resolvable:$true] %s43_s19 }
  0x26   :  { %p753_p3 = scmp.lt.u32.totalorder %s749_s23, %s962_s2 }
  0x28   :  { %p755_p4 = pnand %p753_p3, %p750_p2 }
  0x2a   :  { %758 = shalt.err (!%p755_p4)
}
  0x2b   :  { %s759_s28 = scalar_lea.vmem %s44_s19, 768  ;;  %p764_p6 = scmp.lt.s32.totalorder %s44_s19, %s44_s19 }
  0x2c   :  { %p760_p5 = scmp.ne.s32.totalorder %s44_s19, %s759_s28  ;;  %p765_p7 = scmp.lt.s32.totalorder %s759_s28, %s759_s28 }
  0x2e   :  { %p766_p8 = por %p765_p7, %p764_p6 }
  0x30   :  { %p767_p9 = pnand %p766_p8, %p760_p5 }
  0x32   :  { %770 = shalt.err (!%p767_p9)
}
  0x33   :  { %s828_s0 = smov 384   ;;  %s829_s21 = smov 24  }
  0x34   :  { %49 = dma.hbm_to_vmem [thread:$0]  %s962_s2, 768, %s44_s19, [#allocation6], %s828_s0, %s828_s0, %s829_s21  }
  0x35   :  { %s830_s8 = smov [#allocation8]   ;;  %s771_s12 = scalar_lea.hbm %s963_s3, 6144 }
  0x36   :  { %s55_s9 = sshll.u32 %s830_s8, 4  ;;  %p772_p10 = scmp.ne.s32.totalorder %s963_s3, %s771_s12  ;;  %s56_s9 = int_to_ptr.vmem [resolvable:$true] %s55_s9 }
  0x37   :  { %p775_p11 = scmp.lt.u32.totalorder %s771_s12, %s963_s3 }
  0x39   :  { %p777_p12 = pnand %p775_p11, %p772_p10 }
  0x3b   :  { %780 = shalt.err (!%p777_p12)
}
  0x3c   :  { %s781_s1 = scalar_lea.vmem %s56_s9, 6144  ;;  %p786_p0 = scmp.lt.s32.totalorder %s56_s9, %s56_s9 }
  0x3d   :  { %p782_p13 = scmp.ne.s32.totalorder %s56_s9, %s781_s1  ;;  %p787_p1 = scmp.lt.s32.totalorder %s781_s1, %s781_s1 }
  0x3f   :  { %p788_p2 = por %p787_p1, %p786_p0 }
  0x41   :  { %p789_p3 = pnand %p788_p2, %p782_p13 }
  0x43   :  { %792 = shalt.err (!%p789_p3)
}
  0x44   :  { %61 = dma.hbm_to_vmem [thread:$0]  %s963_s3, 6144, %s56_s9, [#allocation9], %s828_s0, %s828_s0, %s829_s21  }
  0x45   :  { %815 = dma.done.wait [#allocation3], 256  }
  0x46   :  { %816 = vsyncadd [#allocation3], 4294967040 }
  0x47   :  { %817 = dma.done.wait [#allocation6], 1024  }
  0x48   :  { %818 = vsyncadd [#allocation6], 4294966272 }
  0x49   :  { %819 = dma.done.wait [#allocation9], 6144  }
  0x4a   :  { %820 = vsyncadd [#allocation9], 4294961152  ;;  %v831_v0 = vmov 0.0   ;;  %v81_v1 = vld [vmem:[#allocation7 + $0x8] sm:$0xff]  ;;  %v84_v2 = vld [vmem:[#allocation7 + $0x20] sm:$0xff]  ;;  %vm86_vm0 = vcmask 130048  }
  0x4b   :  { %157 = vmatprep.mubr.f32.mxu0 %v831_v0  ;;  %v80_v3 = vld [vmem:[#allocation7] sm:$0xff]  ;;  %v595_v4 = vpack.c.bf16 %v84_v2, %v81_v1  ;;  %v83_v5 = vld [vmem:[#allocation7 + $0x18] sm:$0xff]  ;;  %v249_v7 = vld [vmem:[#allocation8 + $0x20] sm:$0xff] }
  0x4c   :  { %v246_v6 = vld [vmem:[#allocation8 + $0x8] sm:$0xff]  ;;  %v597_v8 = vpack.c.bf16 %v83_v5, %v80_v3  ;;  %v78_v10 = vld [vmem:[#allocation2] sm:$0xff]  ;;  %v245_v11 = vld [vmem:[#allocation8] sm:$0xff] }
  0x4d   :  { %v603_v9 = vpack.c.bf16 %v249_v7, %v246_v6  ;;  %v248_v12 = vld [vmem:[#allocation8 + $0x18] sm:$0xff]  ;;  %596 = vmatprep.subr.bf16.mxu0 %v595_v4  ;;  %v255_v14 = vld [vmem:[#allocation8 + $0x50] sm:$0xff]  ;;  %557 = vmatprep.mubr.msk.f32.mxu1 %vm86_vm0, %v78_v10  ;;  %v254_v18 = vld [vmem:[#allocation8 + $0x48] sm:$0xff] }
  0x4e   :  { %v252_v13 = vld [vmem:[#allocation8 + $0x38] sm:$0xff]  ;;  %598 = vmatpush1.bf16.msra.mxu0 %v597_v8  ;;  %v605_v15 = vpack.c.bf16 %v248_v12, %v245_v11  ;;  %v251_v17 = vld [vmem:[#allocation8 + $0x30] sm:$0xff]  ;;  %v258_v19 = vld [vmem:[#allocation8 + $0x68] sm:$0xff] }
  0x4f   :  { %604 = vmatprep.subr.bf16.mxu0 %v603_v9  ;;  %v607_v16 = vpack.c.bf16 %v255_v14, %v252_v13  ;;  %v261_v20 = vld [vmem:[#allocation8 + $0x80] sm:$0xff]  ;;  %v609_v21 = vpack.c.bf16 %v254_v18, %v251_v17  ;;  %v260_v24 = vld [vmem:[#allocation8 + $0x78] sm:$0xff]  ;;  %v267_v27 = vld [vmem:[#allocation8 + $0xb0] sm:$0xff] }
  0x50   :  { %v611_v22 = vpack.c.bf16 %v261_v20, %v258_v19  ;;  %v257_v23 = vld [vmem:[#allocation8 + $0x60] sm:$0xff]  ;;  %v264_v26 = vld [vmem:[#allocation8 + $0x98] sm:$0xff]  ;;  %v247_v30 = vld [vmem:[#allocation8 + $0x10] sm:$0xff] }
  0x51   :  { %523 = vmatmul.mubr.msk.f32.vlgmr.msra.gmra.mrb[0].mxu0 %vm86_vm0, %v78_v10  ;;  %v82_v25 = vld [vmem:[#allocation7 + $0x10] sm:$0xff]  ;;  %v85_v28 = vld [vmem:[#allocation7 + $0x28] sm:$0xff]  ;;  %v613_v31 = vpack.c.bf16 %v260_v24, %v257_v23  ;;  %v250_v32 = vld [vmem:[#allocation8 + $0x28] sm:$0xff]  ;;  %v615_v34 = vpack.c.bf16 %v267_v27, %v264_v26 }
  0x52   :  { %606 = vmatpush1.bf16.msra.mxu0 %v605_v15  ;;  %163 = vmatprep.mubr.f32.mxu0 %v831_v0  ;;  %v599_v29 = vpack.c.bf16 %v85_v28, %v82_v25  ;;  %v79_v33 = vld [vmem:[#allocation2 + $0x8] sm:$0xff]  ;;  %v263_v35 = vld [vmem:[#allocation8 + $0x90] sm:$0xff]  ;;  %v266_v36 = vld [vmem:[#allocation8 + $0xa8] sm:$0xff]  ;;  %v635_v38 = vpack.c.bf16 %v250_v32, %v247_v30  ;;  %v295_v25 = vlaneseq }
  0x53   :  { %608 = vmatprep.subr.bf16.mxu0 %v607_v16  ;;  %v270_v37 = vld [vmem:[#allocation8 + $0xc8] sm:$0xff]  ;;  %v273_v39 = vld [vmem:[#allocation8 + $0xe0] sm:$0xff]  ;;  %v256_v41 = vld [vmem:[#allocation8 + $0x58] sm:$0xff]  ;;  %v617_v43 = vpack.c.bf16 %v266_v36, %v263_v35 }
  0x54   :  { %600 = vmatprep.subr.bf16.mxu1 %v599_v29  ;;  %v253_v40 = vld [vmem:[#allocation8 + $0x40] sm:$0xff]  ;;  %v259_v44 = vld [vmem:[#allocation8 + $0x70] sm:$0xff]  ;;  %v262_v45 = vld [vmem:[#allocation8 + $0x88] sm:$0xff]  ;;  %v619_v46 = vpack.c.bf16 %v273_v39, %v270_v37  ;;  %v296_v26 = vshrl.u32 %v295_v25, 7 }
  0x55   :  { %602 = vmatpush3.bf16.msra.mxu1 %v599_v29  ;;  %524 = vmatmul.mubr.msk.f32.gmra.mrb[2].mxu0 %vm86_vm0, %v79_v33  ;;  %v639_v42 = vpack.c.bf16 %v256_v41, %v253_v40  ;;  %v269_v47 = vld [vmem:[#allocation8 + $0xc0] sm:$0xff]  ;;  %v272_v48 = vld [vmem:[#allocation8 + $0xd8] sm:$0xff]  ;;  %v279_v51 = vld [vmem:[#allocation8 + $0x110] sm:$0xff]  ;;  %v643_v52 = vpack.c.bf16 %v262_v45, %v259_v44 }
  0x56   :  { %610 = vmatpush1.bf16.msra.mxu0 %v609_v21  ;;  %636 = vmatprep.subr.bf16.mxu1 %v635_v38  ;;  %v931_v49 = vld [vmem:[#allocation5] sm:$0xff]  ;;  %v276_v50 = vld [vmem:[#allocation8 + $0xf8] sm:$0xff]  ;;  %v621_v53 = vpack.c.bf16 %v272_v48, %v269_v47  ;;  %v275_v57 = vld [vmem:[#allocation8 + $0xf0] sm:$0xff]  ;;  %v301_v27 = vsub.s32 1, %v296_v26  ;;  %v305_v47 = vsub.s32 2, %v296_v26 }
  0x57   :  { %612 = vmatprep.subr.bf16.mxu0 %v611_v22  ;;  %374 = vmatprep.mubr.f32.mxu0 %v831_v0  ;;  %v265_v54 = vld [vmem:[#allocation8 + $0xa0] sm:$0xff]  ;;  %v268_v55 = vld [vmem:[#allocation8 + $0xb8] sm:$0xff]  ;;  %v623_v56 = vpack.c.bf16 %v279_v51, %v276_v50  ;;  %v278_v58 = vld [vmem:[#allocation8 + $0x108] sm:$0xff] }
  0x58   :  { %558 = vmatmul.mubr.msk.f32.vlgmr.msra.gmra.mrb[0].mxu1 %vm86_vm0, %v79_v33  ;;  %v282_v59 = vld [vmem:[#allocation8 + $0x128] sm:$0xff]  ;;  %v285_v60 = vld [vmem:[#allocation8 + $0x140] sm:$0xff]  ;;  %v647_v61 = vpack.c.bf16 %v268_v55, %v265_v54  ;;  %v625_v62 = vpack.c.bf16 %v278_v58, %v275_v57  ;;  %v271_v63 = vld [vmem:[#allocation8 + $0xd0] sm:$0xff] }
  0x59   :  { %638 = vmatpush3.bf16.msra.mxu1 %v635_v38  ;;  %592 = vmatprep.mubr.f32.mxu1 %v931_v49  ;;  %v274_v1 = vld [vmem:[#allocation8 + $0xe8] sm:$0xff]  ;;  %v627_v2 = vpack.c.bf16 %v285_v60, %v282_v59  ;;  %v281_v3 = vld [vmem:[#allocation8 + $0x120] sm:$0xff]  ;;  %v284_v4 = vld [vmem:[#allocation8 + $0x138] sm:$0xff] }
  0x5a   :  { %614 = vmatpush1.bf16.msra.mxu0 %v613_v31  ;;  %640 = vmatprep.subr.bf16.mxu1 %v639_v42  ;;  %v288_v5 = vld [vmem:[#allocation8 + $0x158] sm:$0xff]  ;;  %v291_v6 = vld [vmem:[#allocation8 + $0x170] sm:$0xff]  ;;  %v651_v7 = vpack.c.bf16 %v274_v1, %v271_v63  ;;  %v629_v8 = vpack.c.bf16 %v284_v4, %v281_v3  ;;  %v277_v9 = vld [vmem:[#allocation8 + $0x100] sm:$0xff]  ;;  %v297_v31 = vsub.s32 0, %v296_v26 }
  0x5b   :  { %616 = vmatprep.subr.bf16.mxu0 %v615_v34  ;;  %v280_v10 = vld [vmem:[#allocation8 + $0x118] sm:$0xff]  ;;  %v631_v11 = vpack.c.bf16 %v291_v6, %v288_v5  ;;  %v287_v12 = vld [vmem:[#allocation8 + $0x150] sm:$0xff]  ;;  %v290_v13 = vld [vmem:[#allocation8 + $0x168] sm:$0xff] }
  0x5c   :  { %v655_v14 = vpack.c.bf16 %v280_v10, %v277_v9  ;;  %v633_v15 = vpack.c.bf16 %v290_v13, %v287_v12  ;;  %v283_v16 = vld [vmem:[#allocation8 + $0x130] sm:$0xff]  ;;  %v286_v17 = vld [vmem:[#allocation8 + $0x148] sm:$0xff]  ;;  %v289_v19 = vld [vmem:[#allocation8 + $0x160] sm:$0xff] }
  0x5d   :  { %642 = vmatpush3.bf16.msra.mxu1 %v639_v42  ;;  %v659_v18 = vpack.c.bf16 %v286_v17, %v283_v16  ;;  %v292_v20 = vld [vmem:[#allocation8 + $0x178] sm:$0xff]  ;;  %v936_v22 = vld [vmem:[#allocation5 + $0x8] sm:$0xff]  ;;  %v293_v28 = vld [vmem:[%s964_s4] sm:$0x7]  ;;  %s832_s4 = smov [#allocation10]  }
  0x5e   :  { %618 = vmatpush1.bf16.msra.mxu0 %v617_v43  ;;  %644 = vmatprep.subr.bf16.mxu1 %v643_v52  ;;  %v663_v21 = vpack.c.bf16 %v292_v20, %v289_v19  ;;  %v302_v29 = vrot.slane %v293_v28, %v301_v27  ;;  %v298_v36 = vrot.slane %v293_v28, %v297_v31  ;;  %s509_s19 = sshll.u32 %s832_s4, 4  ;;  %s510_s19 = int_to_ptr.vmem [resolvable:$true] %s509_s19 }
  0x5f   :  { %620 = vmatprep.subr.bf16.mxu0 %v619_v46  ;;  %v306_v51 = vrot.slane %v293_v28, %v305_v47  ;;  %s793_s20 = scalar_lea.vmem %s510_s19, 256  ;;  %p798_p5 = scmp.lt.s32.totalorder %s510_s19, %s510_s19 }
  0x60   :  { %p794_p4 = scmp.ne.s32.totalorder %s510_s19, %s793_s20  ;;  %p799_p6 = scmp.lt.s32.totalorder %s793_s20, %s793_s20 }
  0x61   :  { %646 = vmatpush3.bf16.msra.mxu1 %v643_v52 }
  0x62   :  { %622 = vmatpush1.bf16.msra.mxu0 %v621_v53  ;;  %648 = vmatprep.subr.bf16.mxu1 %v647_v61  ;;  %p800_p7 = por %p799_p6, %p798_p5 }
  0x63   :  { %624 = vmatprep.subr.bf16.mxu0 %v623_v56 }
  0x64   :  { %p801_p8 = pnand %p800_p7, %p794_p4 }
  0x65   :  { %650 = vmatpush3.bf16.msra.mxu1 %v647_v61 }
  0x66   :  { %626 = vmatpush1.bf16.msra.mxu0 %v625_v62  ;;  %652 = vmatprep.subr.bf16.mxu1 %v651_v7 }
  0x67   :  { %628 = vmatprep.subr.bf16.mxu0 %v627_v2 }
  0x69   :  { %654 = vmatpush3.bf16.msra.mxu1 %v651_v7 }
  0x6a   :  { %630 = vmatpush1.bf16.msra.mxu0 %v629_v8  ;;  %656 = vmatprep.subr.bf16.mxu1 %v655_v14 }
  0x6b   :  { %632 = vmatprep.subr.bf16.mxu0 %v631_v11 }
  0x6d   :  { %658 = vmatpush3.bf16.msra.mxu1 %v655_v14 }
  0x6e   :  { %634 = vmatpush1.bf16.msra.mxu0 %v633_v15  ;;  %660 = vmatprep.subr.bf16.mxu1 %v659_v18 }
  0x71   :  { %375 = vmatmul.mubr.f32.vlgmr.msra.gmra.mrb[0].mxu0 %v931_v49  ;;  %662 = vmatpush3.bf16.msra.mxu1 %v659_v18 }
  0x72   :  { %380 = vmatprep.mubr.f32.mxu0 %v831_v0  ;;  %664 = vmatprep.subr.bf16.mxu1 %v663_v21 }
  0x75   :  { %381 = vmatmul.mubr.f32.gmra.mrb[2].mxu0 %v936_v22  ;;  %666 = vmatpush3.bf16.msra.mxu1 %v663_v21 }
  0x78   :  { %593 = vmatmul.mubr.f32.vlgmr.msra.gmra.mrb[2].mxu1 %v936_v22 }
 0x12b   :  { %v559_v23 = vpop.f32.mrb[0].mxu1 }
 0x12c   :  { %v236_v24 = vpop.f32.mrb[1].mxu1 }
 0x144   :  { %v376_v0 = vpop.f32.mrb[0].mxu0 }
 0x145   :  { %v378_v30 = vpop.f32.mrb[1].mxu0  ;;  %v377_v39 = vadd.f32 %v376_v0, %v298_v36 }
 0x146   :  { %v379_v32 = vadd.f32 %v378_v30, %v302_v29 }
 0x147   :  { %v527_v42 = vmul.f32 -1.442695, %v377_v39 }
 0x148   :  { %v529_v33 = vmul.f32 -1.442695, %v379_v32  ;;  %v382_v34 = vpop.f32.mrb[2].mxu0 }
 0x149   :  { %v384_v35 = vpop.f32.mrb[3].mxu0  ;;  %v383_v43 = vadd.f32 %v382_v34, %v298_v36 }
 0x14a   :  { %685 = vpow2.f32 %v529_v33  ;;  %v385_v37 = vadd.f32 %v384_v35, %v302_v29 }
 0x14b   :  { %v594_v40 = vpop.f32.mrb[2].mxu1  ;;  %v528_v46 = vmul.f32 -1.442695, %v383_v43 }
 0x14c   :  { %v530_v38 = vmul.f32 -1.442695, %v385_v37  ;;  %v453_v41 = vpop.f32.mrb[3].mxu1  ;;  %v459_v55 = vadd.f32 %v594_v40, %v306_v51 }
 0x14d   :  { %v454_v52 = vadd.f32 %v453_v41, %v306_v51 }
 0x14e   :  { %687 = vpow2.f32 %v530_v38 }
 0x14f   :  { %689 = vpow2.f32 %v527_v42 }
 0x154   :  { %v686_v44 = vpop.eup %685 }
 0x155   :  { %v484_v45 = vadd.f32 1.0, %v686_v44 }
 0x157   :  { %691 = vrcp.f32 %v484_v45 }
 0x158   :  { %v688_v48 = vpop.eup %687  ;;  %693 = vpow2.f32 %v528_v46 }
 0x159   :  { %v485_v50 = vadd.f32 1.0, %v688_v48  ;;  %v690_v53 = vpop.eup %689 }
 0x15a   :  { %v470_v58 = vadd.f32 1.0, %v690_v53 }
 0x15b   :  { %695 = vrcp.f32 %v485_v50 }
 0x161   :  { %v692_v54 = vpop.eup %691 }
 0x162   :  { %v490_v56 = vmul.f32 %v692_v54, %v454_v52  ;;  %v694_v57 = vpop.eup %693 }
 0x163   :  { %v471_v62 = vadd.f32 1.0, %v694_v57 }
 0x164   :  { %v492_v59 = vadd.f32 %v490_v56, %v236_v24 }
 0x165   :  { %v696_v60 = vpop.eup %695 }
 0x166   :  { %v491_v61 = vmul.f32 %v696_v60, %v459_v55  ;;  %697 = vtanh.f32 %v492_v59 }
 0x167   :  { %699 = vrcp.f32 %v470_v58 }
 0x168   :  { %v493_v63 = vadd.f32 %v559_v23, %v491_v61 }
 0x16a   :  { %701 = vtanh.f32 %v493_v63 }
 0x16b   :  { %703 = vrcp.f32 %v471_v62 }
 0x170   :  { %v698_v1 = vpop.eup %697 }
 0x171   :  { %v496_v2 = vsub.f32 %v931_v49, %v698_v1  ;;  %v700_v3 = vpop.eup %699 }
 0x173   :  { %v498_v4 = vmul.f32 %v700_v3, %v496_v2 }
 0x174   :  { %v702_v5 = vpop.eup %701 }
 0x175   :  { %v497_v6 = vsub.f32 %v936_v22, %v702_v5  ;;  %v500_v7 = vadd.f32 %v698_v1, %v498_v4  ;;  %v704_v8 = vpop.eup %703 }
 0x177   :  { %v499_v9 = vmul.f32 %v704_v8, %v497_v6  ;;  %502 = vst [vmem:[#allocation10] sm:$0xff] %v500_v7 }
 0x179   :  { %v501_v10 = vadd.f32 %v702_v5, %v499_v9 }
 0x17b   :  { %503 = vst [vmem:[#allocation10 + $0x8] sm:$0xff] %v501_v10 }
 0x17c   :  { %804 = shalt.err (!%p801_p8)
}
 0x17d   :  { %s805_s24 = scalar_lea.hbm %s965_s5, 256 }
 0x17e   :  { %p806_p9 = scmp.ne.s32.totalorder %s965_s5, %s805_s24  ;;  %p809_p10 = scmp.lt.u32.totalorder %s805_s24, %s965_s5 }
 0x180   :  { %p811_p11 = pnand %p809_p10, %p806_p9 }
 0x182   :  { %814 = shalt.err (!%p811_p11)
}
 0x183   :  { %515 = dma.vmem_to_hbm [thread:$0]  %s510_s19, 256, %s965_s5, [#allocation4], %s825_s30, %s825_s30, %s826_s6  }
 0x184   :  { %821 = dma.done.wait [#allocation4], 256  }
 0x185   :  { %822 = vsyncadd [#allocation4], 4294967040 }
 0x186   :  { %519 = vsyncpa [#allocation3], 1 }
 0x187   :  { %520 = vsyncpa [#allocation6], 1 }
 0x188   :  { %521 = vsyncpa [#allocation9], 1 }
 0x189   :  { %522 = vsyncpa [#allocation4], 1 }

</bundles_post_ra>
